<compile_context>
chip_gen: v7x
topology: tpu7x:2x2x1
jax: 0.10.0
libtpu: 0.0.40
codegen_flags: <defaults>
</compile_context>

<pallas_src>
import jax
import jax.numpy as jnp
from jax.experimental import pallas as pl
from jax.experimental.pallas import tpu as pltpu


def _round_up(n, m):
    return (n + m - 1) // m * m


def mlp_kernel(x_ref, w1_ref, b1_ref, w2_ref, b2_ref, w3_ref, b3_ref, o_ref):
    # x arrives as f32 straight from HBM; the bf16 repack happens here on the VPU
    # (free under the HBM-bound regime). All matmuls accumulate in f32 on the MXU;
    # bias add + ReLU are f32 on the VPU.
    x = x_ref[...].astype(jnp.bfloat16)
    h1 = jnp.dot(x, w1_ref[...], preferred_element_type=jnp.float32) + b1_ref[...]
    h1 = jnp.maximum(h1, 0.0).astype(jnp.bfloat16)
    h2 = jnp.dot(h1, w2_ref[...], preferred_element_type=jnp.float32) + b2_ref[...]
    h2 = jnp.maximum(h2, 0.0).astype(jnp.bfloat16)
    o = jnp.dot(h2, w3_ref[...], preferred_element_type=jnp.float32) + b3_ref[...]
    o_ref[...] = o.astype(o_ref.dtype)


def prepare_params(params):
    """One-time preprocessing (hoisted out of the hot path): bf16 weights, f32 (1,n) biases."""
    prep = {}
    for i in (1, 2, 3):
        prep[f"w{i}"] = params[f"w{i}"].astype(jnp.bfloat16)
        prep[f"b{i}"] = params[f"b{i}"].astype(jnp.float32).reshape(1, -1)
    return prep


def gesture_model_forward(x, prepared, *, batch_tile=2048):
    """x: (B, input_dim) float32. prepared: output of prepare_params().

    Returns (B, output_dim) float32.
    """
    B, in_dim = x.shape
    w1, b1 = prepared["w1"], prepared["b1"]
    w2, b2 = prepared["w2"], prepared["b2"]
    w3, b3 = prepared["w3"], prepared["b3"]
    h1_dim, h2_dim, out_dim = w1.shape[1], w2.shape[1], w3.shape[1]

    # Batch tile: multiple of 8 (sublane), large enough to amortize per-step overhead,
    # but at most ~B/2 so large batches keep >= 2 grid steps (v7x megacore sharding).
    bt = max(8, min(batch_tile, _round_up(pl.cdiv(B, 2), 8)))
    # Keep double-buffered f32 x/out tiles (+ tiny resident weights) well inside the
    # scoped-VMEM default on every generation.
    bytes_per_row = 2 * 4 * (in_dim + out_dim)
    bt = min(bt, max(8, (8 * 1024 * 1024 // bytes_per_row) // 8 * 8))

    # Ragged B: Pallas masks the partial last tile on store, so no wrapper pad pass.
    # Only pad when B is smaller than a single sublane-aligned tile (B < 8).
    x_work, B_work = x, B
    if bt > B:
        B_work = bt
        x_work = jnp.pad(x, ((0, bt - B), (0, 0)))
    grid = (pl.cdiv(B_work, bt),)

    flops = 2 * B_work * (in_dim * h1_dim + h1_dim * h2_dim + h2_dim * out_dim)
    bytes_accessed = (
        4 * B_work * (in_dim + out_dim)                                   # x in, out back
        + 2 * (in_dim * h1_dim + h1_dim * h2_dim + h2_dim * out_dim)      # bf16 weights
        + 4 * (h1_dim + h2_dim + out_dim)                                 # f32 biases
    )

    const2d = lambda shape: pl.BlockSpec(shape, lambda i: (0, 0))  # VMEM-resident block

    out = pl.pallas_call(
        mlp_kernel,
        out_shape=jax.ShapeDtypeStruct((B_work, out_dim), jnp.float32),
        grid_spec=pl.GridSpec(
            grid=grid,
            in_specs=[
                pl.BlockSpec((bt, in_dim), lambda i: (i, 0)),   # x tile streams (f32)
                const2d((in_dim, h1_dim)),                      # w1 (resident, bf16)
                const2d((1, h1_dim)),                           # b1 (f32)
                const2d((h1_dim, h2_dim)),                      # w2
                const2d((1, h2_dim)),                           # b2
                const2d((h2_dim, out_dim)),                     # w3 (no lane padding)
                const2d((1, out_dim)),                          # b3
            ],
            out_specs=pl.BlockSpec((bt, out_dim), lambda i: (i, 0)),  # narrow f32 writeback
        ),
        compiler_params=pltpu.CompilerParams(
            dimension_semantics=("parallel",),
        ),
        cost_estimate=pl.CostEstimate(
            flops=flops, transcendentals=0, bytes_accessed=bytes_accessed),
    )(x_work, w1, b1, w2, b2, w3, b3)

    return out if B_work == B else out[:B]


def init_params(key, input_dim, output_dim, dtype=jnp.float32):
    """Deterministic init mimicking nn.Linear's uniform(-1/sqrt(fan_in), 1/sqrt(fan_in))."""
    dims = [(input_dim, 128), (128, 64), (64, output_dim)]
    params = {}
    for idx, (fan_in, fan_out) in enumerate(dims, start=1):
        key, kw, kb = jax.random.split(key, 3)
        bound = 1.0 / (fan_in ** 0.5)
        params[f"w{idx}"] = jax.random.uniform(
            kw, (fan_in, fan_out), dtype, minval=-bound, maxval=bound)
        params[f"b{idx}"] = jax.random.uniform(
            kb, (1, fan_out), dtype, minval=-bound, maxval=bound)
    return params


def reference_forward(x, p):
    """Reference matching the kernel's precision path (bf16 operands, f32 accumulate)."""
    bf = jnp.bfloat16
    h1 = jnp.dot(x.astype(bf), p["w1"].astype(bf),
                 preferred_element_type=jnp.float32) + p["b1"]
    h1 = jnp.maximum(h1, 0.0)
    h2 = jnp.dot(h1.astype(bf), p["w2"].astype(bf),
                 preferred_element_type=jnp.float32) + p["b2"]
    h2 = jnp.maximum(h2, 0.0)
    return jnp.dot(h2.astype(bf), p["w3"].astype(bf),
                   preferred_element_type=jnp.float32) + p["b3"]


if __name__ == "__main__":
    key = jax.random.PRNGKey(0)
    B, input_dim, output_dim = 8, 32, 16

    key, kx = jax.random.split(key)
    x = jax.random.normal(kx, (B, input_dim), jnp.float32)
    params = init_params(key, input_dim, output_dim)
    prepared = prepare_params(params)          # hoisted one-time weight prep

    out = gesture_model_forward(x, prepared)
    out = jax.block_until_ready(out)

    ref = reference_forward(x, params)
    assert out.shape == (B, output_dim)
    assert jnp.allclose(out, ref, atol=1e-3, rtol=1e-3)

    print("KERNEL_OK")
</pallas_src>

<mosaic_0001>
module attributes {stable_mosaic.version = 11 : i64} {
  func.func @mlp_kernel(%arg0: i32, %arg1: memref<8x32xf32, #tpu.memory_space<vmem>>, %arg2: memref<32x128xbf16, #tpu.memory_space<vmem>>, %arg3: memref<1x128xf32, #tpu.memory_space<vmem>>, %arg4: memref<128x64xbf16, #tpu.memory_space<vmem>>, %arg5: memref<1x64xf32, #tpu.memory_space<vmem>>, %arg6: memref<64x16xbf16, #tpu.memory_space<vmem>>, %arg7: memref<1x16xf32, #tpu.memory_space<vmem>>, %arg8: memref<8x16xf32, #tpu.memory_space<vmem>>) attributes {dimension_semantics = [#tpu.dimension_semantics<parallel>], iteration_bounds = array<i64: 1>, scalar_prefetch = 0 : i64, scratch_operands = 0 : i64, tpu.core_type = #tpu.core_type<tc>, window_params = [{transform_indices = @transform_0, window_bounds = array<i64: 8, 32>}, {pipeline_mode = #tpu.pipeline_mode<synchronous>, transform_indices = @transform_1, window_bounds = array<i64: 32, 128>}, {pipeline_mode = #tpu.pipeline_mode<synchronous>, transform_indices = @transform_2, window_bounds = array<i64: 1, 128>}, {pipeline_mode = #tpu.pipeline_mode<synchronous>, transform_indices = @transform_3, window_bounds = array<i64: 128, 64>}, {pipeline_mode = #tpu.pipeline_mode<synchronous>, transform_indices = @transform_4, window_bounds = array<i64: 1, 64>}, {pipeline_mode = #tpu.pipeline_mode<synchronous>, transform_indices = @transform_5, window_bounds = array<i64: 64, 16>}, {pipeline_mode = #tpu.pipeline_mode<synchronous>, transform_indices = @transform_6, window_bounds = array<i64: 1, 16>}, {transform_indices = @transform_7, window_bounds = array<i64: 8, 16>}]} {
    %c0 = arith.constant 0 : index
    %c0_0 = arith.constant 0 : index
    %0 = vector.load %arg1[%c0, %c0_0] : memref<8x32xf32, #tpu.memory_space<vmem>>, vector<8x32xf32>
    %1 = arith.truncf %0 : vector<8x32xf32> to vector<8x32xbf16>
    %c0_1 = arith.constant 0 : index
    %c0_2 = arith.constant 0 : index
    %2 = vector.load %arg2[%c0_1, %c0_2] : memref<32x128xbf16, #tpu.memory_space<vmem>>, vector<32x128xbf16>
    %cst = arith.constant dense<0.000000e+00> : vector<8x128xf32>
    %3 = tpu.matmul %1, %2, %cst {dimension_numbers = #tpu.dot_dimension_numbers<[1], [0], [0], [1], [0, 0, 1, 1], [], []>} : vector<8x32xbf16>, vector<32x128xbf16>, vector<8x128xf32> -> vector<8x128xf32>
    %c0_3 = arith.constant 0 : index
    %c0_4 = arith.constant 0 : index
    %4 = vector.load %arg3[%c0_3, %c0_4] : memref<1x128xf32, #tpu.memory_space<vmem>>, vector<1x128xf32>
    %5 = vector.broadcast %4 : vector<1x128xf32> to vector<8x128xf32>
    %6 = arith.addf %3, %5 : vector<8x128xf32>
    %cst_5 = arith.constant 0.000000e+00 : f32
    %7 = vector.broadcast %cst_5 : f32 to vector<8x128xf32>
    %8 = arith.maximumf %6, %7 : vector<8x128xf32>
    %9 = arith.truncf %8 : vector<8x128xf32> to vector<8x128xbf16>
    %c0_6 = arith.constant 0 : index
    %c0_7 = arith.constant 0 : index
    %10 = vector.load %arg4[%c0_6, %c0_7] : memref<128x64xbf16, #tpu.memory_space<vmem>>, vector<128x64xbf16>
    %cst_8 = arith.constant dense<0.000000e+00> : vector<8x64xf32>
    %11 = tpu.matmul %9, %10, %cst_8 {dimension_numbers = #tpu.dot_dimension_numbers<[1], [0], [0], [1], [0, 0, 1, 1], [], []>} : vector<8x128xbf16>, vector<128x64xbf16>, vector<8x64xf32> -> vector<8x64xf32>
    %c0_9 = arith.constant 0 : index
    %c0_10 = arith.constant 0 : index
    %12 = vector.load %arg5[%c0_9, %c0_10] : memref<1x64xf32, #tpu.memory_space<vmem>>, vector<1x64xf32>
    %13 = vector.broadcast %12 : vector<1x64xf32> to vector<8x64xf32>
    %14 = arith.addf %11, %13 : vector<8x64xf32>
    %cst_11 = arith.constant 0.000000e+00 : f32
    %15 = vector.broadcast %cst_11 : f32 to vector<8x64xf32>
    %16 = arith.maximumf %14, %15 : vector<8x64xf32>
    %17 = arith.truncf %16 : vector<8x64xf32> to vector<8x64xbf16>
    %c0_12 = arith.constant 0 : index
    %c0_13 = arith.constant 0 : index
    %18 = vector.load %arg6[%c0_12, %c0_13] : memref<64x16xbf16, #tpu.memory_space<vmem>>, vector<64x16xbf16>
    %cst_14 = arith.constant dense<0.000000e+00> : vector<8x16xf32>
    %19 = tpu.matmul %17, %18, %cst_14 {dimension_numbers = #tpu.dot_dimension_numbers<[1], [0], [0], [1], [0, 0, 1, 1], [], []>} : vector<8x64xbf16>, vector<64x16xbf16>, vector<8x16xf32> -> vector<8x16xf32>
    %c0_15 = arith.constant 0 : index
    %c0_16 = arith.constant 0 : index
    %20 = vector.load %arg7[%c0_15, %c0_16] : memref<1x16xf32, #tpu.memory_space<vmem>>, vector<1x16xf32>
    %21 = vector.broadcast %20 : vector<1x16xf32> to vector<8x16xf32>
    %22 = arith.addf %19, %21 : vector<8x16xf32>
    %c0_17 = arith.constant 0 : index
    %c0_18 = arith.constant 0 : index
    %23 = vector.load %arg8[%c0_17, %c0_18] : memref<8x16xf32, #tpu.memory_space<vmem>>, vector<8x16xf32>
    tpu.vector_store %arg8[%c0_17, %c0_18], %22 {strides = array<i32>} : memref<8x16xf32, #tpu.memory_space<vmem>>, vector<8x16xf32>,
    return
  }
  func.func @transform_0(%arg0: i32) -> (i32, i32) {
    %c0_i32 = arith.constant 0 : i32
    %c0_i32_0 = arith.constant 0 : i32
    return %arg0, %c0_i32 : i32, i32
  }
  func.func @transform_1(%arg0: i32) -> (i32, i32) {
    %c0_i32 = arith.constant 0 : i32
    %c0_i32_0 = arith.constant 0 : i32
    %c0_i32_1 = arith.constant 0 : i32
    return %c0_i32, %c0_i32_0 : i32, i32
  }
  func.func @transform_2(%arg0: i32) -> (i32, i32) {
    %c0_i32 = arith.constant 0 : i32
    %c0_i32_0 = arith.constant 0 : i32
    %c0_i32_1 = arith.constant 0 : i32
    return %c0_i32, %c0_i32_0 : i32, i32
  }
  func.func @transform_3(%arg0: i32) -> (i32, i32) {
    %c0_i32 = arith.constant 0 : i32
    %c0_i32_0 = arith.constant 0 : i32
    %c0_i32_1 = arith.constant 0 : i32
    return %c0_i32, %c0_i32_0 : i32, i32
  }
  func.func @transform_4(%arg0: i32) -> (i32, i32) {
    %c0_i32 = arith.constant 0 : i32
    %c0_i32_0 = arith.constant 0 : i32
    %c0_i32_1 = arith.constant 0 : i32
    return %c0_i32, %c0_i32_0 : i32, i32
  }
  func.func @transform_5(%arg0: i32) -> (i32, i32) {
    %c0_i32 = arith.constant 0 : i32
    %c0_i32_0 = arith.constant 0 : i32
    %c0_i32_1 = arith.constant 0 : i32
    return %c0_i32, %c0_i32_0 : i32, i32
  }
  func.func @transform_6(%arg0: i32) -> (i32, i32) {
    %c0_i32 = arith.constant 0 : i32
    %c0_i32_0 = arith.constant 0 : i32
    %c0_i32_1 = arith.constant 0 : i32
    return %c0_i32, %c0_i32_0 : i32, i32
  }
  func.func @transform_7(%arg0: i32) -> (i32, i32) {
    %c0_i32 = arith.constant 0 : i32
    %c0_i32_0 = arith.constant 0 : i32
    return %arg0, %c0_i32 : i32, i32
  }
}

</mosaic_0001>

<bundles_post_ra>
// kernel: tpu_custom_call.1
= control target key start
LH: loop header
LB: loop body
LE: loop exit
PB: predicated region body
PF: predicated region fallthrough
CT: control target
= control target key end

     0   :  { %v428_v1 = vmov 0.0   ;;  %vm429_vm0 = vmmov 0   ;;  %vm53_vm1 = vcmask 261120   ;;  %s540_s0 = inlined_call_operand.vmem [shape: f32[8,32], index: 0, kind: input, shape index: {}]   ;;  %s541_s1 = inlined_call_operand.vmem [shape: bf16[32,128], index: 1, kind: input, shape index: {}]   ;;  %s542_s2 = inlined_call_operand.vmem [shape: f32[1,128], index: 2, kind: input, shape index: {}]   ;;  %s543_s3 = inlined_call_operand.vmem [shape: bf16[128,64], index: 3, kind: input, shape index: {}]   ;;  %s544_s4 = inlined_call_operand.vmem [shape: f32[1,64], index: 4, kind: input, shape index: {}]   ;;  %s545_s5 = inlined_call_operand.vmem [shape: bf16[64,16], index: 5, kind: input, shape index: {}]   ;;  %s546_s6 = inlined_call_operand.vmem [shape: f32[1,16], index: 6, kind: input, shape index: {}]   ;;  %s547_s7 = inlined_call_operand.hbm [shape: f32[8,16], index: 7, kind: output, shape index: {}]  }
   0x1   :  { %v390_v0 = vld [vmem:[%s541_s1] sm:$0xff]   ;;  %347 = vmatprep.subr.bf16.mxu0 %v428_v1  ;;  %v391_v2 = vld [vmem:[%s541_s1 + $0x8] sm:$0xff]   ;;  %355 = vmatprep.subr.bf16.mxu1 %v428_v1  ;;  %v394_v7 = vld [vmem:[%s543_s3 + $0x10] sm:$0xff]  }
   0x2   :  { %348 = vmatpush3.bf16.msra.mxu0 %v390_v0  ;;  %351 = vmatprep.mubr.msk.bf16.mxu0 %vm429_vm0, %v428_v1  ;;  %v28_v3 = vld [vmem:[%s540_s0] sm:$0xff]  ;;  %v393_v6 = vld [vmem:[%s543_s3 + $0x8] sm:$0xff]  }
   0x3   :  { %349 = vmatprep.subr.bf16.mxu0 %v428_v1  ;;  %v392_v4 = vld [vmem:[%s543_s3] sm:$0xff]   ;;  %371 = vmatprep.mubr.msk.bf16.mxu1 %vm429_vm0, %v428_v1  ;;  %v29_v5 = vpack.c.bf16 %v28_v3, %v28_v3 }
   0x4   :  { %356 = vmatpush3.bf16.msra.mxu1 %v392_v4 }
   0x5   :  { %357 = vmatprep.subr.bf16.mxu1 %v428_v1 }
   0x6   :  { %350 = vmatpush3.bf16.msra.mxu0 %v391_v2 }
   0x7   :  { %375 = vmatprep.subr.bf16.mxu0 %v428_v1 }
   0x8   :  { %358 = vmatpush3.bf16.msra.mxu1 %v393_v6 }
   0x9   :  { %352 = vmatmul.mubr.msk.bf16.vlgmr.msra.gmra.mrb[0].mxu0 %vm53_vm1, %v29_v5  ;;  %359 = vmatprep.subr.bf16.mxu1 %v428_v1 }
   0xa   :  { %383 = vmatprep.mubr.msk.bf16.mxu0 %vm429_vm0, %v428_v1 }
   0xb   :  { %12 = vsyncpa [#allocation3], 0  ;;  %v395_v8 = vld [vmem:[%s543_s3 + $0x18] sm:$0xff]   ;;  %v396_v9 = vld [vmem:[%s543_s3 + $0x20] sm:$0xff]   ;;  %vm251_vm2 = vcmask 523264   ;;  %s430_s1 = smov [#allocation2]  }
   0xc   :  { %360 = vmatpush3.bf16.msra.mxu1 %v394_v7  ;;  %v397_v10 = vld [vmem:[%s543_s3 + $0x28] sm:$0xff]   ;;  %v398_v11 = vld [vmem:[%s543_s3 + $0x30] sm:$0xff]   ;;  %v399_v12 = vld [vmem:[%s543_s3 + $0x38] sm:$0xff]   ;;  %vm295_vm3 = vcmask 130048  }
   0xd   :  { %361 = vmatprep.subr.bf16.mxu1 %v428_v1  ;;  %v400_v13 = vld [vmem:[%s545_s5] sm:$0xff]   ;;  %v401_v14 = vld [vmem:[%s545_s5 + $0x8] sm:$0xff]   ;;  %v402_v23 = vld [vmem:[%s545_s5 + $0x10] sm:$0xff]  }
   0xe   :  { %376 = vmatpush3.bf16.msra.mxu0 %v400_v13  ;;  %v311_v15 = vld [vmem:[%s542_s2] ss:$0 sm:$0xff]  ;;  %v403_v24 = vld [vmem:[%s545_s5 + $0x18] sm:$0xff]   ;;  %s303_s5 = sshll.u32 %s430_s1, 4  ;;  %s304_s5 = int_to_ptr.vmem [resolvable:$true] %s303_s5 }
   0xf   :  { %377 = vmatprep.subr.bf16.mxu0 %v428_v1  ;;  %v315_v25 = vld [vmem:[%s544_s4] ss:$0 sm:$0xff]  ;;  %s404_s4 = scalar_lea.vmem %s304_s5, 128  ;;  %p409_p1 = scmp.lt.s32.totalorder %s304_s5, %s304_s5 }
  0x10   :  { %362 = vmatpush3.bf16.msra.mxu1 %v395_v8  ;;  %v324_v33 = vld [vmem:[%s546_s6] ss:$0 sm:$0xff]  ;;  %p405_p0 = scmp.ne.s32.totalorder %s304_s5, %s404_s4  ;;  %p410_p2 = scmp.lt.s32.totalorder %s404_s4, %s404_s4 }
  0x11   :  { %363 = vmatprep.subr.bf16.mxu1 %v428_v1 }
  0x12   :  { %378 = vmatpush3.bf16.msra.mxu0 %v401_v14  ;;  %p411_p3 = por %p410_p2, %p409_p1 }
  0x13   :  { %379 = vmatprep.subr.bf16.mxu0 %v428_v1 }
  0x14   :  { %364 = vmatpush3.bf16.msra.mxu1 %v396_v9  ;;  %p412_p4 = pnand %p411_p3, %p405_p0 }
  0x15   :  { %365 = vmatprep.subr.bf16.mxu1 %v428_v1 }
  0x16   :  { %380 = vmatpush3.bf16.msra.mxu0 %v402_v23 }
  0x17   :  { %381 = vmatprep.subr.bf16.mxu0 %v428_v1 }
  0x18   :  { %366 = vmatpush3.bf16.msra.mxu1 %v397_v10 }
  0x19   :  { %367 = vmatprep.subr.bf16.mxu1 %v428_v1 }
  0x1a   :  { %382 = vmatpush3.bf16.msra.mxu0 %v403_v24 }
  0x1c   :  { %368 = vmatpush3.bf16.msra.mxu1 %v398_v11 }
  0x1d   :  { %369 = vmatprep.subr.bf16.mxu1 %v428_v1 }
  0x20   :  { %370 = vmatpush3.bf16.msra.mxu1 %v399_v12 }
  0xdc   :  { %v91_v16 = vpop.f32.mrb[0].mxu0 }
  0xdd   :  { %v92_v17 = vadd.f32 %v311_v15, %v91_v16  ;;  %v353_v18 = vpop.f32.mrb[1].mxu0 }
  0xde   :  { %v94_v19 = vpop.f32.mrb[2].mxu0 }
  0xdf   :  { %v97_v20 = vmax.f32 %v92_v17, 0.0  ;;  %v354_v21 = vpop.f32.mrb[3].mxu0 }
  0xe1   :  { %v98_v22 = vpack.c.bf16 %v97_v20, %v97_v20 }
  0xe3   :  { %372 = vmatmul.mubr.bf16.vlgmr.msra.gmra.mrb[0].mxu1 %v98_v22 }
 0x1b6   :  { %v204_v26 = vpop.f32.mrb[0].mxu1 }
 0x1b7   :  { %v205_v27 = vadd.f32 %v315_v25, %v204_v26  ;;  %v373_v28 = vpop.f32.mrb[1].mxu1 }
 0x1b8   :  { %v207_v29 = vpop.f32.mrb[2].mxu1 }
 0x1b9   :  { %v210_v30 = vmax.f32 %v205_v27, 0.0  ;;  %v374_v31 = vpop.f32.mrb[3].mxu1 }
 0x1bb   :  { %v211_v32 = vpack.c.bf16 %v210_v30, %v210_v30 }
 0x1bd   :  { %384 = vmatmul.mubr.msk.bf16.vlgmr.msra.gmra.mrb[4].mxu0 %vm251_vm2, %v211_v32 }
 0x290   :  { %v289_v34 = vpop.f32.mrb[4].mxu0 }
 0x291   :  { %v290_v35 = vadd.f32 %v324_v33, %v289_v34  ;;  %v385_v36 = vpop.f32.mrb[5].mxu0 }
 0x292   :  { %v292_v37 = vpop.f32.mrb[6].mxu0 }
 0x293   :  { %v386_v38 = vpop.f32.mrb[7].mxu0  ;;  %296 = vst.msk [vmem:[#allocation2] sm:$0xff] %vm295_vm3, %v290_v35 }
 0x294   :  { %415 = shalt.err (!%p412_p4)
}
 0x295   :  { %s416_s6 = scalar_lea.hbm %s547_s7, 128 }
 0x296   :  { %p417_p5 = scmp.ne.s32.totalorder %s547_s7, %s416_s6  ;;  %p420_p6 = scmp.lt.u32.totalorder %s416_s6, %s547_s7 }
 0x298   :  { %p422_p7 = pnand %p420_p6, %p417_p5 }
 0x29a   :  { %425 = shalt.err (!%p422_p7)
}
 0x29b   :  { %306 = dma.vmem_to_hbm [thread:$0]  %s304_s5, 128, %s547_s7, [#allocation3]  }
 0x29c   :  { %426 = dma.done.wait [#allocation3], 128  }
 0x29d   :  { %427 = vsyncadd [#allocation3], 4294967168 }
 0x29e   :  { %310 = vsyncpa [#allocation3], 1 }

</bundles_post_ra>
